<compile_context>
chip_gen: v5e
topology: v5e:2x2
jax: 0.10.0
libtpu: 0.0.40
codegen_flags: <defaults>
</compile_context>

<pallas_src>
import math
import functools

import jax
import jax.numpy as jnp
from jax import lax
from jax.experimental import pallas as pl
from jax.experimental.pallas import tpu as pltpu


def _pos_enc_kernel(offset_ref, aux_ref, x_ref, o_ref, *, tile_rows, ppr):
    """Adds sinusoidal positional encoding to one (tile_rows, L) block.

    offset_ref : SMEM scalar-prefetch ref, shape (1,), int32
    aux_ref    : VMEM ref, shape (3, L) f32: [pos-within-row, inv_freq, is_odd]
    x_ref      : VMEM ref, shape (tile_rows, L), input dtype
    o_ref      : VMEM ref, shape (tile_rows, L), promoted (f32) dtype
    ppr        : positions per row (row r covers sequence positions
                 offset + r*ppr ... offset + r*ppr + ppr - 1)
    """
    i = pl.program_id(0)
    off = offset_ref[0]

    aux = aux_ref[...]                       # (3, L) f32
    col_pos = aux[0:1, :]                    # (1, L) position offset within a row
    inv_freq = aux[1:2, :]                   # (1, L)
    is_odd = aux[2:3, :] > 0.5               # (1, L) bool (feature parity)

    # Sequence position of each element = offset + global_row*ppr + col_pos.
    row = lax.broadcasted_iota(jnp.int32, (tile_rows, 1), 0) + i * tile_rows
    pos = (off + row * ppr).astype(jnp.float32) + col_pos      # (tile_rows, L)

    angle = pos * inv_freq
    # Compute sin and cos and select per parity: exact PyTorch semantics, and the
    # EUP has huge slack in this HBM-bound kernel so the extra transcendental is free.
    pe = jnp.where(is_odd, jnp.cos(angle), jnp.sin(angle))      # (tile_rows, L) f32

    # Add in f32 (parity with PyTorch's f32 pe buffer); output dtype is promoted.
    o_ref[...] = (x_ref[...].astype(jnp.float32) + pe).astype(o_ref.dtype)


def _sublane_align(dtype):
    """Sublane pack: 8 for f32, 16 for bf16, 32 for int8/fp8."""
    return max(8, 32 // jnp.dtype(dtype).itemsize)


def _positions_per_row(S, B, D):
    """Smallest m dividing S such that L = m*B*D is a multiple of 128 (else 1)."""
    bd = B * D
    if bd % 128 == 0:
        return 1
    need = 128 // math.gcd(bd, 128)
    return need if S % need == 0 else 1


def _choose_tile_rows(rows, row_bytes, align, target_bytes):
    """Row tile: sublane-aligned, ~target_bytes, and >=2 grid steps when possible."""
    if rows <= align:
        return rows                                   # single full-extent block
    cap_bytes = max(align, (target_bytes // max(1, row_bytes)) // align * align)
    cap_split = max(align, (rows // 2) // align * align)   # keep >= 2 blocks (megacore)
    return min(cap_bytes, cap_split)


def positional_encoding(x, offset=0, *, tile_rows=None, target_block_bytes=4 << 20):
    """x: (S, B, D).  Returns x + pe[offset:offset+S] (eval-mode forward)."""
    S, B, D = x.shape
    out_dtype = jnp.promote_types(x.dtype, jnp.float32)   # x + f32 pe promotes

    m = _positions_per_row(S, B, D)                        # positions per row
    L = m * B * D
    rows = S // m
    x2 = x.reshape(rows, L)                                # contiguous row-major view

    align = max(_sublane_align(x.dtype), _sublane_align(out_dtype))
    row_bytes = L * max(jnp.dtype(x.dtype).itemsize, jnp.dtype(out_dtype).itemsize)
    if tile_rows is None:
        tile_rows = _choose_tile_rows(rows, row_bytes, align, target_block_bytes)
    grid = (pl.cdiv(rows, tile_rows),)                     # ragged last block OK

    # Per-column constants (computed once, outside the grid loop):
    c = jnp.arange(L, dtype=jnp.int32)
    feat = c % D
    col_pos = (c // (B * D)).astype(jnp.float32)           # position offset in row
    inv_freq = jnp.exp((feat & -2).astype(jnp.float32) * (-math.log(10000.0) / D))
    is_odd = (feat & 1).astype(jnp.float32)
    aux = jnp.stack([col_pos, inv_freq, is_odd], axis=0)   # (3, L) f32

    offset_arr = jnp.asarray([offset], dtype=jnp.int32)

    kernel = functools.partial(_pos_enc_kernel, tile_rows=tile_rows, ppr=m)

    grid_spec = pltpu.PrefetchScalarGridSpec(
        num_scalar_prefetch=1,
        grid=grid,
        in_specs=[pl.BlockSpec((3, L), lambda i, off: (0, 0)),         # constant aux
                  pl.BlockSpec((tile_rows, L), lambda i, off: (i, 0))],
        out_specs=pl.BlockSpec((tile_rows, L), lambda i, off: (i, 0)),
    )

    out2 = pl.pallas_call(
        kernel,
        out_shape=jax.ShapeDtypeStruct((rows, L), out_dtype),
        grid_spec=grid_spec,
        compiler_params=pltpu.CompilerParams(
            dimension_semantics=("parallel",),
            # 4 MiB blocks * (2 in-bufs + 2 out-bufs) + f32 temporaries fits with
            # headroom; explicit limit so v5e (16 MiB default scoped VMEM) can use
            # the same large tiles, and we stay well under v7x's 64 MiB physical.
            vmem_limit_bytes=40 * 1024 * 1024),
    )(offset_arr, aux, x2)

    return out2.reshape(S, B, D)


def _reference(x, offset, max_len=5000):
    """Pure-JAX reproduction of the PyTorch buffer + forward (eval mode)."""
    S, B, D = x.shape
    position = jnp.arange(max_len, dtype=jnp.float32)[:, None]
    div_term = jnp.exp(jnp.arange(0, D, 2, dtype=jnp.float32)
                       * (-math.log(10000.0) / D))
    pe = jnp.zeros((max_len, D), dtype=jnp.float32)
    pe = pe.at[:, 0::2].set(jnp.sin(position * div_term))
    pe = pe.at[:, 1::2].set(jnp.cos(position * div_term))
    pe = pe[:, None, :]  # (max_len, 1, D)
    return x + pe[offset:offset + S]


if __name__ == "__main__":
    key = jax.random.PRNGKey(0)

    # Case 1: small shape from the module: seq=8, batch=2, d_model=32 (f32).
    # Lane-dense fold: 2 positions per row -> (4, 128) view, unmasked stores.
    S, B, D = 8, 2, 32
    x = jax.random.normal(key, (S, B, D), dtype=jnp.float32)
    out = jax.block_until_ready(positional_encoding(x, offset=3))
    ref = _reference(x, offset=3)
    assert out.shape == (S, B, D) and out.dtype == jnp.float32
    assert jnp.allclose(out, ref, atol=1e-5, rtol=1e-5)

    # Case 2: D already a multiple of 128; multi-step grid (rows=16, tile=8 -> 2 steps).
    S2, B2, D2 = 16, 4, 128
    x2 = jax.random.normal(jax.random.PRNGKey(1), (S2, B2, D2), dtype=jnp.float32)
    out2 = jax.block_until_ready(positional_encoding(x2, offset=7))
    ref2 = _reference(x2, offset=7)
    assert jnp.allclose(out2, ref2, atol=1e-5, rtol=1e-5)

    # Case 3: bf16 input -> f32 output (matches PyTorch promotion); 16-row sublane
    # alignment for bf16 and a 2-step grid.
    S3, B3, D3 = 32, 2, 64
    x3 = jax.random.normal(jax.random.PRNGKey(2), (S3, B3, D3), dtype=jnp.bfloat16)
    out3 = jax.block_until_ready(positional_encoding(x3, offset=5))
    ref3 = _reference(x3, offset=5)
    assert out3.dtype == jnp.float32
    assert jnp.allclose(out3, ref3, atol=1e-5, rtol=1e-5)

    print("KERNEL_OK")
</pallas_src>

<mosaic_0001>
module attributes {stable_mosaic.version = 11 : i64} {
  func.func @_pos_enc_kernel(%arg0: i32, %arg1: memref<1xi32, #tpu.memory_space<smem>>, %arg2: memref<3x128xf32, #tpu.memory_space<vmem>>, %arg3: memref<4x128xf32, #tpu.memory_space<vmem>>, %arg4: memref<4x128xf32, #tpu.memory_space<vmem>>) attributes {dimension_semantics = [#tpu.dimension_semantics<parallel>], iteration_bounds = array<i64: 1>, scalar_prefetch = 1 : i64, scratch_operands = 0 : i64, tpu.core_type = #tpu.core_type<tc>, window_params = [{pipeline_mode = #tpu.pipeline_mode<synchronous>, transform_indices = @transform_0, window_bounds = array<i64: 3, 128>}, {transform_indices = @transform_1, window_bounds = array<i64: 4, 128>}, {transform_indices = @transform_2, window_bounds = array<i64: 4, 128>}]} {
    %c0 = arith.constant 0 : index
    %0 = memref.load %arg1[%c0] : memref<1xi32, #tpu.memory_space<smem>>
    %c0_0 = arith.constant 0 : index
    %c0_1 = arith.constant 0 : index
    %1 = vector.load %arg2[%c0_0, %c0_1] : memref<3x128xf32, #tpu.memory_space<vmem>>, vector<3x128xf32>
    %2 = vector.extract_strided_slice %1 {offsets = [0, 0], sizes = [1, 128], strides = [1, 1]} : vector<3x128xf32> to vector<1x128xf32>
    %3 = vector.extract_strided_slice %1 {offsets = [1, 0], sizes = [1, 128], strides = [1, 1]} : vector<3x128xf32> to vector<1x128xf32>
    %4 = vector.extract_strided_slice %1 {offsets = [2, 0], sizes = [1, 128], strides = [1, 1]} : vector<3x128xf32> to vector<1x128xf32>
    %cst = arith.constant 5.000000e-01 : f32
    %5 = vector.broadcast %cst : f32 to vector<1x128xf32>
    %6 = arith.cmpf ogt, %4, %5 : vector<1x128xf32>
    %7 = tpu.iota {dimensions = array<i32: 0>} : vector<4x1xi32>
    %c4_i32 = arith.constant 4 : i32
    %8 = arith.muli %arg0, %c4_i32 : i32
    %9 = vector.broadcast %8 : i32 to vector<4x1xi32>
    %10 = arith.addi %7, %9 : vector<4x1xi32>
    %c2_i32 = arith.constant 2 : i32
    %11 = vector.broadcast %c2_i32 : i32 to vector<4x1xi32>
    %12 = arith.muli %10, %11 : vector<4x1xi32>
    %13 = vector.broadcast %0 : i32 to vector<4x1xi32>
    %14 = arith.addi %13, %12 : vector<4x1xi32>
    %15 = arith.sitofp %14 : vector<4x1xi32> to vector<4x1xf32>
    %16 = vector.broadcast %15 : vector<4x1xf32> to vector<4x128xf32>
    %17 = vector.broadcast %2 : vector<1x128xf32> to vector<4x128xf32>
    %18 = arith.addf %16, %17 : vector<4x128xf32>
    %19 = vector.broadcast %3 : vector<1x128xf32> to vector<4x128xf32>
    %20 = arith.mulf %18, %19 : vector<4x128xf32>
    %21 = math.cos %20 : vector<4x128xf32>
    %22 = math.sin %20 : vector<4x128xf32>
    %23 = vector.shape_cast %6 : vector<1x128xi1> to vector<1x128xi1>
    %24 = vector.broadcast %23 : vector<1x128xi1> to vector<4x128xi1>
    %25 = arith.select %24, %21, %22 : vector<4x128xi1>, vector<4x128xf32>
    %c0_2 = arith.constant 0 : index
    %c0_3 = arith.constant 0 : index
    %26 = vector.load %arg3[%c0_2, %c0_3] : memref<4x128xf32, #tpu.memory_space<vmem>>, vector<4x128xf32>
    %27 = arith.addf %26, %25 : vector<4x128xf32>
    %c0_4 = arith.constant 0 : index
    %c0_5 = arith.constant 0 : index
    %28 = vector.load %arg4[%c0_4, %c0_5] : memref<4x128xf32, #tpu.memory_space<vmem>>, vector<4x128xf32>
    tpu.vector_store %arg4[%c0_4, %c0_5], %27 {strides = array<i32>} : memref<4x128xf32, #tpu.memory_space<vmem>>, vector<4x128xf32>,
    return
  }
  func.func @transform_0(%arg0: i32, %arg1: memref<1xi32, #tpu.memory_space<smem>>) -> (i32, i32) {
    %c0_i32 = arith.constant 0 : i32
    %c0_i32_0 = arith.constant 0 : i32
    %c0_i32_1 = arith.constant 0 : i32
    return %c0_i32, %c0_i32_0 : i32, i32
  }
  func.func @transform_1(%arg0: i32, %arg1: memref<1xi32, #tpu.memory_space<smem>>) -> (i32, i32) {
    %c0_i32 = arith.constant 0 : i32
    %c0_i32_0 = arith.constant 0 : i32
    return %arg0, %c0_i32 : i32, i32
  }
  func.func @transform_2(%arg0: i32, %arg1: memref<1xi32, #tpu.memory_space<smem>>) -> (i32, i32) {
    %c0_i32 = arith.constant 0 : i32
    %c0_i32_0 = arith.constant 0 : i32
    return %arg0, %c0_i32 : i32, i32
  }
}

</mosaic_0001>

<bundles_post_ra>
// kernel: tpu_custom_call.1
= control target key start
LH: loop header
LB: loop body
LE: loop exit
PB: predicated region body
PF: predicated region fallthrough
CT: control target
= control target key end

     0   :  { %9 = vsyncpa [#allocation5], 0  ;;  %s579_s0 = inlined_call_operand.<no memory space> [shape: s32[1], index: 0, kind: input, shape index: {}]   ;;  %s580_s1 = inlined_call_operand.hbm [shape: f32[3,128], index: 1, kind: input, shape index: {}]   ;;  %s581_s2 = inlined_call_operand.hbm [shape: f32[4,128], index: 2, kind: input, shape index: {}]   ;;  %s582_s3 = inlined_call_operand.hbm [shape: f32[4,128], index: 3, kind: output, shape index: {}]  }
   0x1   :  { %10 = vsyncpa [#allocation8], 0 }
   0x2   :  { %11 = vsyncpa [#allocation6], 0  ;;  %s17_s14 = sshll.u32 %s580_s1, 4  ;;  %s486_s15 = smov [#allocation4]   ;;  %s18_s14 = int_to_ptr.hbm [resolvable:$true] %s17_s14 }
   0x3   :  { %s19_s16 = sshll.u32 %s486_s15, 4  ;;  %s28_s19 = sshll.u32 %s581_s2, 4  ;;  %s20_s16 = int_to_ptr.vmem [resolvable:$true] %s19_s16  ;;  %s29_s19 = int_to_ptr.hbm [resolvable:$true] %s28_s19 }
   0x4   :  { %22 = dma.hbm_to_vmem [thread:$0]  %s18_s14, 64, %s20_s16, [#allocation5]  }
   0x5   :  { %s487_s20 = smov [#allocation7]  }
   0x6   :  { %s30_s21 = sshll.u32 %s487_s20, 4  ;;  %s31_s21 = int_to_ptr.vmem [resolvable:$true] %s30_s21 }
   0x7   :  { %33 = dma.hbm_to_vmem [thread:$0]  %s29_s19, 64, %s31_s21, [#allocation8]  }
   0x8   :  { %480 = dma.done.wait [#allocation5], 64  }
   0x9   :  { %481 = vsyncadd [#allocation5], 4294967232 }
   0xa   :  { %482 = dma.done.wait [#allocation8], 64  }
   0xb   :  { %483 = vsyncadd [#allocation8], 4294967232  ;;  %v45_v0 = vlaneseq  ;;  %v51_v2 = vstv %s579_s0  ;;  %v525_v5 = vld [vmem:[#allocation4] sm:$0x7]  ;;  %v488_v22 = vmov 683565275  }
   0xc   :  { %v54_v7 = vperm.slane %v525_v5, 0  ;;  %v56_v8 = vperm.slane %v525_v5, 1  ;;  %v489_v24 = vmov 2475754826   ;;  %v490_v26 = vmov 2131351028  }
   0xd   :  { %v46_v1 = vshrl.u32 %v45_v0, 7  ;;  %v491_v28 = vmov 2102212464   ;;  %v492_v30 = vmov 920167782   ;;  %vm44_vm12 = vcmp.gt.f32.partialorder %v525_v5, 0.5 }
   0xe   :  { %v493_v36 = vmov 1326507024   ;;  %s495_s0 = smov [#allocation9]   ;;  %s381_s25 = sshll.u32 %s582_s3, 4  ;;  %s382_s25 = int_to_ptr.hbm [resolvable:$true] %s381_s25 }
   0xf   :  { %v50_v3 = vmul.u32 2, %v46_v1  ;;  %s379_s2 = sshll.u32 %s495_s0, 4  ;;  %s380_s2 = int_to_ptr.vmem [resolvable:$true] %s379_s2 }
  0x11   :  { %v52_v4 = vadd.s32 %v51_v2, %v50_v3 }
  0x13   :  { %v53_v6 = vcvt.s32.f32 %v52_v4 }
  0x15   :  { %v55_v9 = vadd.f32 %v54_v7, %v53_v6 }
  0x17   :  { %v529_v10 = vmul.f32 %v56_v8, %v55_v9 }
  0x19   :  { %v61_v11 = vand.u32 2139095040, %v529_v10  ;;  %v58_v13 = vand.u32 2147483647, %v529_v10  ;;  %vm60_vm13 = vcmp.lt.s32.totalorder %v529_v10, 0 }
  0x1b   :  { %v62_v12 = vshrl.u32 %v61_v11, 23  ;;  %v65_v16 = vand.u32 8388607, %v58_v13  ;;  %vm59_vm14 = vcmp.le.f32.partialorder %v58_v13, 0.7853982 }
  0x1d   :  { %v392_v14 = vadd.s32 4294967169, %v62_v12  ;;  %v66_v19 = vor.u32 8388608, %v65_v16  ;;  %v494_v12 = vmov 0  }
  0x1f   :  { %v68_v15 = vadd.s32 1, %v392_v14  ;;  %v538_v38 = vshll.u32 %v66_v19, 8 }
  0x21   :  { %vm69_vm0 = vcmp.gt.s32.totalorder %v68_v15, 0  ;;  %v107_v50 = vand.u32 65535, %v538_v38  ;;  %v108_v51 = vshrl.u32 %v538_v38, 16 }
  0x22   :  { %v70_v17 = vsel %vm69_vm0, %v68_v15, 0 }
  0x23   :  { %v72_v18 = vand.u32 31, %v70_v17  ;;  %v535_v20 = vshrl.u32 %v70_v17, 5 }
  0x25   :  { %v73_v21 = vsub.s32 32, %v72_v18  ;;  %v75_v23 = vshll.u32 %v488_v22, %v72_v18  ;;  %v78_v25 = vshll.u32 %v489_v24, %v72_v18  ;;  %v81_v27 = vshll.u32 %v490_v26, %v72_v18 }
  0x26   :  { %v84_v29 = vshll.u32 %v491_v28, %v72_v18  ;;  %v87_v31 = vshll.u32 %v492_v30, %v72_v18  ;;  %vm90_vm1 = vcmp.lt.s32.totalorder %v535_v20, 1  ;;  %vm93_vm2 = vcmp.lt.s32.totalorder %v535_v20, 4 }
  0x27   :  { %v76_v32 = vshrl.u32 %v489_v24, %v73_v21  ;;  %v79_v33 = vshrl.u32 %v490_v26, %v73_v21  ;;  %v82_v34 = vshrl.u32 %v491_v28, %v73_v21  ;;  %v85_v35 = vshrl.u32 %v492_v30, %v73_v21 }
  0x28   :  { %v88_v37 = vshrl.u32 %v493_v36, %v73_v21  ;;  %vm92_vm3 = vcmp.lt.s32.totalorder %v535_v20, 3  ;;  %vm91_vm4 = vcmp.lt.s32.totalorder %v535_v20, 2  ;;  %v74_v58 = vshrl.u32 %v488_v22, %v73_v21 }
  0x29   :  { %v77_v39 = vor.u32 %v76_v32, %v75_v23  ;;  %v80_v40 = vor.u32 %v79_v33, %v78_v25  ;;  %v83_v41 = vor.u32 %v82_v34, %v81_v27  ;;  %v86_v42 = vor.u32 %v85_v35, %v84_v29 }
  0x2a   :  { %v89_v43 = vor.u32 %v88_v37, %v87_v31 }
  0x2b   :  { %v98_v44 = vsel %vm90_vm1, %v77_v39, %v80_v40  ;;  %v102_v45 = vsel %vm90_vm1, %v80_v40, %v83_v41  ;;  %v99_v46 = vsel %vm93_vm2, %v86_v42, 920167782  ;;  %v94_v8 = vsel %vm90_vm1, %v74_v58, %v77_v39 }
  0x2c   :  { %v103_v47 = vsel %vm93_vm2, %v89_v43, 1326507024  ;;  %v100_v48 = vsel %vm92_vm3, %v83_v41, %v99_v46  ;;  %v95_v11 = vsel %vm93_vm2, %v83_v41, 2102212464 }
  0x2d   :  { %v104_v49 = vsel %vm92_vm3, %v86_v42, %v103_v47  ;;  %v101_v52 = vsel %vm91_vm4, %v98_v44, %v100_v48  ;;  %v96_v23 = vsel %vm92_vm3, %v80_v40, %v95_v11 }
  0x2e   :  { %v105_v53 = vsel %vm91_vm4, %v102_v45, %v104_v49  ;;  %v131_v56 = vand.u32 65535, %v101_v52  ;;  %v132_v57 = vshrl.u32 %v101_v52, 16  ;;  %v97_v31 = vsel %vm91_vm4, %v94_v8, %v96_v23 }
  0x2f   :  { %v109_v54 = vand.u32 65535, %v105_v53  ;;  %v110_v55 = vshrl.u32 %v105_v53, 16  ;;  %v151_v35 = vmul.u32 %v538_v38, %v97_v31  ;;  %v367_v53 = vsel %vm44_vm12, 1, %v494_v12 }
  0x30   :  { %v133_v62 = vmul.u32 %v131_v56, %v107_v50  ;;  %v134_v63 = vmul.u32 %v132_v57, %v107_v50  ;;  %v135_v0 = vmul.u32 %v131_v56, %v108_v51  ;;  %v136_v4 = vmul.u32 %v132_v57, %v108_v51 }
  0x31   :  { %v111_v59 = vmul.u32 %v109_v54, %v107_v50  ;;  %v112_v60 = vmul.u32 %v110_v55, %v107_v50  ;;  %v113_v61 = vmul.u32 %v109_v54, %v108_v51  ;;  %v114_v1 = vmul.u32 %v110_v55, %v108_v51 }
  0x32   :  { %v137_v6 = vshll.u32 %v134_v63, 16  ;;  %v139_v7 = vshll.u32 %v135_v0, 16  ;;  %v138_v21 = vshrl.u32 %v134_v63, 16  ;;  %v140_v27 = vshrl.u32 %v135_v0, 16 }
  0x33   :  { %v115_v2 = vshll.u32 %v112_v60, 16  ;;  %v117_v3 = vshll.u32 %v113_v61, 16  ;;  %v116_v16 = vshrl.u32 %v112_v60, 16  ;;  %v118_v24 = vshrl.u32 %v113_v61, 16 }
  0x34   :  { %vm141_vm6 = vc.u32 %v133_v62, %v137_v6  ;;  %v143_v15 = vadd.s32 %v137_v6, %v133_v62 }
  0x35   :  { %vm119_vm5 = vc.u32 %v111_v59, %v115_v2  ;;  %v121_v9 = vadd.s32 %v115_v2, %v111_v59  ;;  %v142_v18 = vsel %vm141_vm6, 1, %v494_v12 }
  0x36   :  { %v120_v14 = vsel %vm119_vm5, 1, %v494_v12  ;;  %v144_v22 = vadd.s32 %v142_v18, %v136_v4  ;;  %vm145_vm8 = vc.u32 %v143_v15, %v139_v7  ;;  %v147_v30 = vadd.s32 %v143_v15, %v139_v7 }
  0x37   :  { %v122_v17 = vadd.s32 %v120_v14, %v114_v1  ;;  %vm123_vm7 = vc.u32 %v121_v9, %v117_v3  ;;  %v146_v26 = vsel %vm145_vm8, 1, %v494_v12  ;;  %vm201_vm5 = vweird.f32 %v529_v10 }
  0x38   :  { %v124_v19 = vsel %vm123_vm7, 1, %v494_v12  ;;  %v148_v28 = vadd.s32 %v146_v26, %v144_v22  ;;  %v368_v22 = vperm.slane %v367_v53, 2 }
  0x39   :  { %v126_v25 = vadd.s32 %v124_v19, %v122_v17 }
  0x3a   :  { %v149_v32 = vadd.s32 %v148_v28, %v138_v21  ;;  %vm369_vm6 = vcmp.eq.s32.totalorder %v368_v22, 1 }
  0x3b   :  { %v127_v29 = vadd.s32 %v126_v25, %v116_v16 }
  0x3c   :  { %v150_v34 = vadd.s32 %v149_v32, %v140_v27 }
  0x3d   :  { %v128_v33 = vadd.s32 %v127_v29, %v118_v24 }
  0x3e   :  { %v154_v36 = vadd.s32 1, %v150_v34 }
  0x3f   :  { %vm153_vm9 = vc.u32 %v128_v33, %v147_v30  ;;  %v152_v20 = vadd.s32 %v147_v30, %v128_v33  ;;  %v371_v30 = vld [vmem:[#allocation7] sm:$0xf] }
  0x40   :  { %v155_v37 = vsel %vm153_vm9, %v154_v36, %v150_v34 }
  0x41   :  { %v156_v39 = vadd.s32 %v155_v37, %v151_v35 }
  0x43   :  { %v157_v40 = vadd.s32 536870912, %v156_v39 }
  0x45   :  { %v158_v41 = vshrl.u32 %v157_v40, 30 }
  0x47   :  { %v159_v42 = vshll.u32 %v158_v41, 30  ;;  %v182_v60 = vsub.s32 4, %v158_v41 }
  0x49   :  { %v160_v43 = vsub.s32 %v156_v39, %v159_v42  ;;  %v183_v62 = vsel %vm60_vm13, %v182_v60, %v158_v41 }
  0x4a   :  { %v185_v1 = vsel %vm59_vm14, 0, %v183_v62 }
  0x4b   :  { %vm161_vm10 = vcmp.lt.s32.totalorder %v160_v43, 0  ;;  %v162_v44 = vsub.s32 0, %v160_v43  ;;  %v356_v7 = vadd.s32 3, %v185_v1  ;;  %v202_v14 = vand.u32 3, %v185_v1 }
  0x4d   :  { %v163_v45 = vsel %vm161_vm10, %v162_v44, %v160_v43  ;;  %v357_v15 = vand.u32 3, %v356_v7  ;;  %vm207_vm15 = vcmp.eq.s32.totalorder %v202_v14, 2  ;;  %vm203_vm1 = vcmp.lt.s32.totalorder %v202_v14, 2 }
  0x4e   :  { %v164_v46 = vclz %v163_v45  ;;  %vm204_vm2 = vcmp.eq.s32.totalorder %v202_v14, 0 }
  0x4f   :  { %vm362_vm0 = vcmp.eq.s32.totalorder %v357_v15, 2  ;;  %vm359_vm3 = vcmp.eq.s32.totalorder %v357_v15, 0  ;;  %vm358_vm4 = vcmp.lt.s32.totalorder %v357_v15, 2 }
  0x50   :  { %v393_v47 = vadd.s32 4294967294, %v164_v46 }
  0x52   :  { %vm394_vm11 = vcmp.lt.s32.totalorder %v393_v47, 0 }
  0x53   :  { %v167_v48 = vsel %vm394_vm11, 0, %v393_v47 }
  0x54   :  { %v168_v49 = vsub.s32 32, %v167_v48  ;;  %v169_v38 = vshll.u32 %v160_v43, %v167_v48  ;;  %v172_v50 = vsub.s32 4294967266, %v167_v48 }
  0x56   :  { %v170_v51 = vshrl.u32 %v152_v20, %v168_v49  ;;  %v173_v52 = vadd.s32 127, %v172_v50 }
  0x58   :  { %v171_v54 = vor.u32 %v170_v51, %v169_v38  ;;  %v174_v55 = vshll.u32 %v173_v52, 23 }
  0x5a   :  { %v175_v56 = vor.u32 4788187, %v174_v55  ;;  %v178_v57 = vcvt.s32.f32 %v171_v54 }
  0x5c   :  { %v176_v58 = vand.u32 2147483647, %v175_v56 }
  0x5e   :  { %v179_v59 = vmul.f32 %v178_v57, %v176_v58 }
  0x60   :  { %v180_v5 = vxor.u32 2147483648, %v179_v59 }
  0x62   :  { %v181_v61 = vsel %vm60_vm13, %v180_v5, %v179_v59 }
  0x63   :  { %v184_v63 = vsel %vm59_vm14, %v529_v10, %v181_v61 }
  0x64   :  { %v186_v0 = vmul.f32 %v184_v63, %v184_v63 }
  0x66   :  { %v187_v2 = vmul.f32 -0.001358992, %v186_v0  ;;  %v194_v3 = vmul.f32 -0.00019511016, %v186_v0 }
  0x68   :  { %v188_v4 = vadd.f32 0.041655596, %v187_v2  ;;  %v195_v6 = vadd.f32 0.008332121, %v194_v3 }
  0x6a   :  { %v189_v8 = vmul.f32 %v188_v4, %v186_v0  ;;  %v196_v9 = vmul.f32 %v195_v6, %v186_v0 }
  0x6c   :  { %v190_v11 = vadd.f32 -0.4999988, %v189_v8  ;;  %v197_v12 = vadd.f32 -0.16666654, %v196_v9 }
  0x6e   :  { %v191_v16 = vmul.f32 %v190_v11, %v186_v0  ;;  %v198_v13 = vmul.f32 %v197_v12, %v186_v0 }
  0x70   :  { %v192_v17 = vadd.f32 1.0, %v191_v16  ;;  %v199_v18 = vadd.f32 1.0, %v198_v13 }
  0x72   :  { %v200_v19 = vmul.f32 %v199_v18, %v184_v63  ;;  %v208_v21 = vxor.u32 2147483648, %v192_v17 }
  0x74   :  { %v205_v23 = vxor.u32 2147483648, %v200_v19  ;;  %v209_v24 = vsel %vm207_vm15, %v208_v21, %v200_v19  ;;  %v364_v25 = vsel %vm362_vm0, %v208_v21, %v200_v19 }
  0x76   :  { %v206_v26 = vsel %vm204_vm2, %v192_v17, %v205_v23  ;;  %v361_v27 = vsel %vm359_vm3, %v192_v17, %v205_v23 }
  0x77   :  { %v210_v28 = vsel %vm203_vm1, %v206_v26, %v209_v24  ;;  %v365_v29 = vsel %vm358_vm4, %v361_v27, %v364_v25 }
  0x78   :  { %v211_v31 = vsel %vm201_vm5, nan, %v210_v28  ;;  %v366_v32 = vsel %vm201_vm5, nan, %v365_v29 }
  0x79   :  { %v370_v33 = vsel %vm369_vm6, %v211_v31, %v366_v32 }
  0x7a   :  { %v372_v34 = vadd.f32 %v371_v30, %v370_v33 }
  0x7c   :  { %373 = vst [vmem:[#allocation9] sm:$0xf] %v372_v34 }
  0x7d   :  { %384 = dma.vmem_to_hbm [thread:$0]  %s380_s2, 64, %s382_s25, [#allocation6]  }
  0x7e   :  { %484 = dma.done.wait [#allocation6], 64  }
  0x7f   :  { %485 = vsyncadd [#allocation6], 4294967232 }
  0x80   :  { %389 = vsyncpa [#allocation5], 1 }
  0x81   :  { %390 = vsyncpa [#allocation8], 1 }
  0x82   :  { %391 = vsyncpa [#allocation6], 1 }

</bundles_post_ra>
